<compile_context>
chip_gen: v7x
topology: tpu7x:2x2x1
jax: 0.10.0
libtpu: 0.0.40
codegen_flags: <defaults>
</compile_context>

<pallas_src>
import jax
import jax.numpy as jnp
from jax.experimental import pallas as pl
from jax.experimental.pallas import tpu as pltpu


# ----------------------------- schedules (glue) -----------------------------

def linear_beta_schedule(beta_start, beta_end, timesteps):
    return jnp.linspace(beta_start, beta_end, timesteps, dtype=jnp.float32)


def quadratic_beta_schedule(beta_start, beta_end, timesteps):
    return jnp.linspace(beta_start ** 0.5, beta_end ** 0.5, timesteps,
                        dtype=jnp.float32) ** 2


def sigmoid_beta_schedule(beta_start, beta_end, timesteps):
    betas = jnp.linspace(beta_start, beta_end, timesteps, dtype=jnp.float32)
    return jax.nn.sigmoid(betas) * (beta_end - beta_start) + beta_start


# ------------------------------- Pallas kernel -------------------------------

_LANES = 512        # lane-dense last dim (multiple of 128)
_TILE_ROWS = 1024   # 1024 x 512 x 4B = 2 MiB per f32 tile -> ~12 MiB w/ double
                    # buffering of 2 inputs + 1 output; safe on v7x (32 MiB
                    # scoped), comfortably within v5e/v6e VMEM.


def _diffusion_encode_kernel(scale_ref, x_ref, noise_ref, o_ref):
    """Pure VPU axpby over one (TR, LANES) tile.

    scale_ref : SMEM ref, shape (2,) float32 -> [sqrt(ab), sqrt(1-ab)]
    x_ref     : VMEM ref, shape (TR, LANES)
    noise_ref : VMEM ref, shape (TR, LANES)
    o_ref     : VMEM ref, shape (TR, LANES)
    """
    sqrt_ab = scale_ref[0]
    sqrt_one_minus_ab = scale_ref[1]
    xv = x_ref[...].astype(jnp.float32)
    nv = noise_ref[...].astype(jnp.float32)
    o_ref[...] = (sqrt_ab * xv + sqrt_one_minus_ab * nv).astype(o_ref.dtype)


def diffusion_encode(x, noise, beta_schedule, timestep):
    """q(x_t | x_0) sample. x/noise: (N, C, H, W). Returns same shape/dtype."""
    orig_shape = x.shape
    orig_dtype = x.dtype
    total = x.size

    # ---- schedule math: hoisted out of the kernel (cheap, done once) ----
    betas = beta_schedule.astype(jnp.float32)
    alpha_bars = jnp.cumprod(1.0 - betas)          # alpha_bar_i = prod_{j<=i}(1-beta_j)
    alpha_bar = alpha_bars[timestep]
    scales = jnp.stack(
        [jnp.sqrt(alpha_bar), jnp.sqrt(1.0 - alpha_bar)]).astype(jnp.float32)

    # ---- flatten to a wide lane-dense slab, pad to a multiple of _LANES ----
    pad = (-total) % _LANES
    xf = x.reshape(-1)
    nf = noise.reshape(-1)
    if pad:
        xf = jnp.pad(xf, (0, pad))
        nf = jnp.pad(nf, (0, pad))
    rows = (total + pad) // _LANES
    x2 = xf.reshape(rows, _LANES)
    n2 = nf.reshape(rows, _LANES)

    # Tile rows: full-array block for small inputs, 2 MiB tiles otherwise.
    tr = min(_TILE_ROWS, rows)
    grid = (pl.cdiv(rows, tr),)

    itemsize = jnp.dtype(orig_dtype).itemsize
    cost = pl.CostEstimate(
        flops=3 * total,              # 2 mul + 1 add per element
        transcendentals=0,
        bytes_accessed=3 * total * itemsize,
    )

    out = pl.pallas_call(
        _diffusion_encode_kernel,
        out_shape=jax.ShapeDtypeStruct((rows, _LANES), orig_dtype),
        grid=grid,
        in_specs=[
            pl.BlockSpec(memory_space=pltpu.MemorySpace.SMEM),   # scales
            pl.BlockSpec((tr, _LANES), lambda i: (i, 0)),        # x
            pl.BlockSpec((tr, _LANES), lambda i: (i, 0)),        # noise
        ],
        out_specs=pl.BlockSpec((tr, _LANES), lambda i: (i, 0)),
        compiler_params=pltpu.CompilerParams(
            dimension_semantics=("parallel",),
            vmem_limit_bytes=32 * 1024 * 1024,
        ),
        cost_estimate=cost,
    )(scales, x2, n2)

    return out.reshape(-1)[:total].reshape(orig_shape)


# ------------------------------------ main ------------------------------------

if __name__ == "__main__":
    key = jax.random.PRNGKey(0)
    kx, kn = jax.random.split(key)

    # small shapes consistent with an image-diffusion encoder (NCHW)
    N, C, H, W = 2, 4, 16, 16
    max_timesteps = 50
    timestep = 10

    x = jax.random.normal(kx, (N, C, H, W), dtype=jnp.float32)
    noise = jax.random.normal(kn, (N, C, H, W), dtype=jnp.float32)

    betas = linear_beta_schedule(1e-4, 0.02, max_timesteps)

    out = diffusion_encode(x, noise, betas, timestep)
    out = jax.block_until_ready(out)

    # reference check in plain JAX
    alpha_bar = jnp.prod(1.0 - betas[: timestep + 1])
    ref = jnp.sqrt(alpha_bar) * x + jnp.sqrt(1.0 - alpha_bar) * noise
    assert out.shape == x.shape and out.dtype == x.dtype
    assert jnp.allclose(out, ref, atol=1e-5, rtol=1e-5), "mismatch vs reference"

    print("KERNEL_OK")
</pallas_src>

<mosaic_0001>
module attributes {stable_mosaic.version = 11 : i64} {
  func.func @_diffusion_encode_kernel(%arg0: i32, %arg1: memref<2xf32, #tpu.memory_space<smem>>, %arg2: memref<4x512xf32, #tpu.memory_space<vmem>>, %arg3: memref<4x512xf32, #tpu.memory_space<vmem>>, %arg4: memref<4x512xf32, #tpu.memory_space<vmem>>) attributes {dimension_semantics = [#tpu.dimension_semantics<parallel>], iteration_bounds = array<i64: 1>, scalar_prefetch = 0 : i64, scratch_operands = 0 : i64, tpu.core_type = #tpu.core_type<tc>, window_params = [{transform_indices = @transform_0, window_bounds = array<i64: 2>}, {transform_indices = @transform_1, window_bounds = array<i64: 4, 512>}, {transform_indices = @transform_2, window_bounds = array<i64: 4, 512>}, {transform_indices = @transform_3, window_bounds = array<i64: 4, 512>}]} {
    %c0 = arith.constant 0 : index
    %0 = memref.load %arg1[%c0] : memref<2xf32, #tpu.memory_space<smem>>
    %c1 = arith.constant 1 : index
    %1 = memref.load %arg1[%c1] : memref<2xf32, #tpu.memory_space<smem>>
    %c0_0 = arith.constant 0 : index
    %c0_1 = arith.constant 0 : index
    %2 = vector.load %arg2[%c0_0, %c0_1] : memref<4x512xf32, #tpu.memory_space<vmem>>, vector<4x512xf32>
    %c0_2 = arith.constant 0 : index
    %c0_3 = arith.constant 0 : index
    %3 = vector.load %arg3[%c0_2, %c0_3] : memref<4x512xf32, #tpu.memory_space<vmem>>, vector<4x512xf32>
    %4 = vector.broadcast %0 : f32 to vector<4x512xf32>
    %5 = arith.mulf %4, %2 : vector<4x512xf32>
    %6 = vector.broadcast %1 : f32 to vector<4x512xf32>
    %7 = arith.mulf %6, %3 : vector<4x512xf32>
    %8 = arith.addf %5, %7 : vector<4x512xf32>
    %c0_4 = arith.constant 0 : index
    %c0_5 = arith.constant 0 : index
    %9 = vector.load %arg4[%c0_4, %c0_5] : memref<4x512xf32, #tpu.memory_space<vmem>>, vector<4x512xf32>
    tpu.vector_store %arg4[%c0_4, %c0_5], %8 {strides = array<i32>} : memref<4x512xf32, #tpu.memory_space<vmem>>, vector<4x512xf32>,
    return
  }
  func.func @transform_0(%arg0: i32) -> i32 {
    %c0_i32 = arith.constant 0 : i32
    %c0_i32_0 = arith.constant 0 : i32
    return %c0_i32 : i32
  }
  func.func @transform_1(%arg0: i32) -> (i32, i32) {
    %c0_i32 = arith.constant 0 : i32
    %c0_i32_0 = arith.constant 0 : i32
    return %arg0, %c0_i32 : i32, i32
  }
  func.func @transform_2(%arg0: i32) -> (i32, i32) {
    %c0_i32 = arith.constant 0 : i32
    %c0_i32_0 = arith.constant 0 : i32
    return %arg0, %c0_i32 : i32, i32
  }
  func.func @transform_3(%arg0: i32) -> (i32, i32) {
    %c0_i32 = arith.constant 0 : i32
    %c0_i32_0 = arith.constant 0 : i32
    return %arg0, %c0_i32 : i32, i32
  }
}

</mosaic_0001>

<bundles_post_ra>
// kernel: tpu_custom_call.1
= control target key start
LH: loop header
LB: loop body
LE: loop exit
PB: predicated region body
PF: predicated region fallthrough
CT: control target
= control target key end

     0   :  { %8 = vsyncpa [#allocation5], 0  ;;  %s244_s0 = inlined_call_operand.hbm [shape: f32[2], index: 0, kind: input, shape index: {}]   ;;  %s245_s1 = inlined_call_operand.hbm [shape: f32[4,512], index: 1, kind: input, shape index: {}]   ;;  %s246_s2 = inlined_call_operand.hbm [shape: f32[4,512], index: 2, kind: input, shape index: {}]   ;;  %s247_s3 = inlined_call_operand.hbm [shape: f32[4,512], index: 3, kind: output, shape index: {}]  }
   0x1   :  { %9 = vsyncpa [#allocation3], 0 }
   0x2   :  { %10 = vsyncpa [#allocation8], 0 }
   0x3   :  { %11 = vsyncpa [#allocation4], 0  ;;  %s88_s14 = scalar_lea.hbm %s244_s0, 16 }
   0x4   :  { %p89_p0 = scmp.ne.s32.totalorder %s244_s0, %s88_s14  ;;  %p92_p1 = scmp.lt.u32.totalorder %s88_s14, %s244_s0 }
   0x6   :  { %p94_p2 = pnand %p92_p1, %p89_p0 }
   0x8   :  { %97 = shalt.err (!%p94_p2)
}
   0x9   :  { %s172_s19 = smov [#allocation2]   ;;  %s173_s22 = smov [#allocation6]  }
   0xa   :  { %19 = dma.hbm_to_smem %s244_s0, 16, %s172_s19, [#allocation5]  }
   0xb   :  { %s26_s23 = sshll.u32 %s173_s22, 4  ;;  %s174_s24 = smov [#allocation7]   ;;  %s27_s23 = int_to_ptr.vmem [resolvable:$true] %s26_s23 }
   0xc   :  { %s36_s25 = sshll.u32 %s174_s24, 4  ;;  %s98_s28 = scalar_lea.hbm %s245_s1, 256  ;;  %s37_s25 = int_to_ptr.vmem [resolvable:$true] %s36_s25 }
   0xd   :  { %p99_p3 = scmp.ne.s32.totalorder %s245_s1, %s98_s28  ;;  %p102_p4 = scmp.lt.u32.totalorder %s98_s28, %s245_s1 }
   0xf   :  { %p104_p5 = pnand %p102_p4, %p99_p3 }
  0x11   :  { %107 = shalt.err (!%p104_p5)
}
  0x12   :  { %s108_s0 = scalar_lea.vmem %s27_s23, 256  ;;  %p113_p7 = scmp.lt.s32.totalorder %s27_s23, %s27_s23 }
  0x13   :  { %p109_p6 = scmp.ne.s32.totalorder %s27_s23, %s108_s0  ;;  %p114_p8 = scmp.lt.s32.totalorder %s108_s0, %s108_s0 }
  0x15   :  { %p115_p9 = por %p114_p8, %p113_p7 }
  0x17   :  { %p116_p10 = pnand %p115_p9, %p109_p6 }
  0x19   :  { %119 = shalt.err (!%p116_p10)
}
  0x1a   :  { %29 = dma.hbm_to_vmem [thread:$0]  %s245_s1, 256, %s27_s23, [#allocation3]  }
  0x1b   :  { %s120_s10 = scalar_lea.hbm %s246_s2, 256 }
  0x1c   :  { %p121_p11 = scmp.ne.s32.totalorder %s246_s2, %s120_s10  ;;  %p124_p12 = scmp.lt.u32.totalorder %s120_s10, %s246_s2 }
  0x1e   :  { %p126_p13 = pnand %p124_p12, %p121_p11 }
  0x20   :  { %129 = shalt.err (!%p126_p13)
}
  0x21   :  { %s130_s15 = scalar_lea.vmem %s37_s25, 256  ;;  %p135_p1 = scmp.lt.s32.totalorder %s37_s25, %s37_s25 }
  0x22   :  { %p131_p0 = scmp.ne.s32.totalorder %s37_s25, %s130_s15  ;;  %p136_p2 = scmp.lt.s32.totalorder %s130_s15, %s130_s15 }
  0x24   :  { %p137_p3 = por %p136_p2, %p135_p1 }
  0x26   :  { %p138_p4 = pnand %p137_p3, %p131_p0 }
  0x28   :  { %141 = shalt.err (!%p138_p4)
}
  0x29   :  { %39 = dma.hbm_to_vmem [thread:$0]  %s246_s2, 256, %s37_s25, [#allocation8]  }
  0x2a   :  { %164 = dma.done.wait [#allocation5], 16  }
  0x2b   :  { %165 = vsyncadd [#allocation5], 4294967280 }
  0x2c   :  { %166 = dma.done.wait [#allocation3], 256  }
  0x2d   :  { %167 = vsyncadd [#allocation3], 4294967040 }
  0x2e   :  { %168 = dma.done.wait [#allocation8], 256  }
  0x2f   :  { %169 = vsyncadd [#allocation8], 4294967040 }
  0x30   :  { %49 = sfence }
  0x31   :  { %s50_s17 = sld [smem:[#allocation2]]  ;;  %s83_s18 = sld [smem:[#allocation2 + $0x1]]  ;;  %v52_v0 = vld [vmem:[#allocation6] sm:$0xff]  ;;  %v54_v1 = vld [vmem:[#allocation7] sm:$0xff]  ;;  %v53_v2 = vld [vmem:[#allocation6 + $0x8] sm:$0xff] }
  0x32   :  { %v55_v3 = vld [vmem:[#allocation7 + $0x8] sm:$0xff]  ;;  %s175_s19 = smov [#allocation9]  }
  0x33   :  { %s72_s20 = sshll.u32 %s175_s19, 4  ;;  %s73_s20 = int_to_ptr.vmem [resolvable:$true] %s72_s20 }
  0x34   :  { %s142_s2 = scalar_lea.vmem %s73_s20, 256  ;;  %p147_p6 = scmp.lt.s32.totalorder %s73_s20, %s73_s20 }
  0x35   :  { %p143_p5 = scmp.ne.s32.totalorder %s73_s20, %s142_s2  ;;  %p148_p7 = scmp.lt.s32.totalorder %s142_s2, %s142_s2 }
  0x37   :  { %v56_v4 = vstv %s50_s17  ;;  %v59_v5 = vstv %s83_s18  ;;  %p149_p8 = por %p148_p7, %p147_p6 }
  0x38   :  { %v57_v6 = vmul.f32 %v56_v4, %v52_v0  ;;  %v60_v7 = vmul.f32 %v59_v5, %v54_v1  ;;  %v58_v8 = vmul.f32 %v56_v4, %v53_v2  ;;  %v61_v9 = vmul.f32 %v59_v5, %v55_v3 }
  0x39   :  { %p150_p9 = pnand %p149_p8, %p143_p5 }
  0x3a   :  { %v62_v10 = vadd.f32 %v60_v7, %v57_v6  ;;  %v63_v11 = vadd.f32 %v61_v9, %v58_v8 }
  0x3c   :  { %64 = vst [vmem:[#allocation9] sm:$0xff] %v62_v10  ;;  %65 = vst [vmem:[#allocation9 + $0x8] sm:$0xff] %v63_v11 }
  0x3d   :  { %153 = shalt.err (!%p150_p9)
}
  0x3e   :  { %s154_s23 = scalar_lea.hbm %s247_s3, 256 }
  0x3f   :  { %p155_p10 = scmp.ne.s32.totalorder %s247_s3, %s154_s23  ;;  %p158_p11 = scmp.lt.u32.totalorder %s154_s23, %s247_s3 }
  0x41   :  { %p160_p12 = pnand %p158_p11, %p155_p10 }
  0x43   :  { %163 = shalt.err (!%p160_p12)
}
  0x44   :  { %75 = dma.vmem_to_hbm [thread:$0]  %s73_s20, 256, %s247_s3, [#allocation4]  }
  0x45   :  { %170 = dma.done.wait [#allocation4], 256  }
  0x46   :  { %171 = vsyncadd [#allocation4], 4294967040 }
  0x47   :  { %79 = vsyncpa [#allocation3], 1 }
  0x48   :  { %80 = vsyncpa [#allocation8], 1 }
  0x49   :  { %81 = vsyncpa [#allocation4], 1 }
  0x4a   :  { %82 = vsyncpa [#allocation5], 1 }

</bundles_post_ra>
